<compile_context>
chip_gen: v6e
topology: v6e:2x2x1
jax: 0.10.0
libtpu: 0.0.40
codegen_flags: <defaults>
</compile_context>

<pallas_src>
import functools

import jax
import jax.numpy as jnp
from jax.experimental import pallas as pl
from jax.experimental.pallas import tpu as pltpu


def _round_up(x, m):
    return ((x + m - 1) // m) * m


def _cdiv(a, b):
    return -(-a // b)


def _qconv_kernel_t(pt_ref, qw_ref, b_ref, s_ref, out_ref):
    """Small-Cout (transposed) layout.

    pt_ref:  [Kpad, TM]    quantized integer activations (bf16/f32), transposed
    qw_ref:  [CoutP, Kpad] quantized integer weights (same dtype)
    b_ref:   [CoutP, 1]    f32 bias
    s_ref:   [4]           f32 SMEM: combined_descale, 1/out_scale, out_thres, out_demul
    out_ref: [CoutP, TM]   f32 quantized conv output (Cout on sublanes, M on lanes)
    """
    acc = jnp.dot(qw_ref[...], pt_ref[...], preferred_element_type=jnp.float32)
    y = acc * s_ref[0] + b_ref[...]
    out_ref[...] = (jnp.round(jnp.clip(y * s_ref[1], -1.0, 1.0) * s_ref[2])
                    * s_ref[3])


def _qconv_kernel_std(p_ref, qw_ref, b_ref, s_ref, out_ref):
    """Large-Cout layout.

    p_ref:   [TM, Kpad]      quantized integer activations (int8/bf16/f32)
    qw_ref:  [Kpad, CoutPad] quantized integer weights (same dtype)
    b_ref:   [1, CoutPad]    f32 bias
    s_ref:   [4]             f32 SMEM scalars
    out_ref: [TM, CoutPad]   f32 quantized conv output
    """
    if jnp.issubdtype(p_ref.dtype, jnp.integer):
        acc = jnp.dot(p_ref[...], qw_ref[...],
                      preferred_element_type=jnp.int32).astype(jnp.float32)
    else:
        acc = jnp.dot(p_ref[...], qw_ref[...], preferred_element_type=jnp.float32)
    y = acc * s_ref[0] + b_ref[...]
    out_ref[...] = (jnp.round(jnp.clip(y * s_ref[1], -1.0, 1.0) * s_ref[2])
                    * s_ref[3])


def _im2col(qx, K, stride, transposed):
    """qx: [N, C, H, W] (already quantized, compact dtype).

    transposed=False -> [N*OH*OW, C*K*K]   (feature order c*K*K + i*K + j)
    transposed=True  -> [C*K*K, N*OH*OW]   (same feature order, M on the minor axis)
    """
    N, C, H, W = qx.shape
    OH = (H - K) // stride + 1
    OW = (W - K) // stride + 1
    cols = []
    for i in range(K):
        for j in range(K):
            cols.append(qx[:, :,
                           i:i + (OH - 1) * stride + 1:stride,
                           j:j + (OW - 1) * stride + 1:stride])
    p = jnp.stack(cols, axis=2)                       # [N, C, K*K, OH, OW]
    if transposed:
        out = p.transpose(1, 2, 0, 3, 4).reshape(C * K * K, N * OH * OW)
    else:
        out = p.transpose(0, 3, 4, 1, 2).reshape(N * OH * OW, C * K * K)
    return out, OH, OW


@functools.partial(jax.jit,
                   static_argnames=("qbit_in", "qbit_w", "qbit_out", "stride"))
def quantize_conv2d(x, weight, bias, *, qbit_in=8, qbit_w=8, qbit_out=8,
                    last_value_input=1.0, last_value_output=1.0, stride=1):
    """Eval-mode forward of QuantizeConv2d. x: [N, Cin, H, W] f32 -> NCHW f32."""
    N, Cin, H, W = x.shape
    Cout, _, K, _ = weight.shape
    Kdim = Cin * K * K

    in_thres = float(2 ** (qbit_in - 1) - 1)
    w_thres = float(2 ** (qbit_w - 1) - 1)
    out_thres = float(2 ** (qbit_out - 1) - 1)

    in_scale = jnp.float32(last_value_input)
    out_scale = jnp.float32(last_value_output)
    # NOTE: no epsilon guard -> an all-zero weight gives inf/NaN exactly like PyTorch.
    w_scale = jnp.max(jnp.abs(weight)).astype(jnp.float32)

    # ---- operand-dtype dispatch (static, trace-time) ----
    small_cout = Cout < 128
    kind = jax.devices()[0].device_kind.lower()
    has_int8_mxu = not any(tag in kind for tag in ("v7", "7x"))   # v7x: no int MXU
    if qbit_in <= 9 and qbit_w <= 9:                              # bf16 exact up to 255
        if (not small_cout) and has_int8_mxu and qbit_in <= 8 and qbit_w <= 8:
            op_dtype = jnp.int8        # v5e/v6e large-Cout path: int8 MXU
        else:
            op_dtype = jnp.bfloat16    # exact small integers, full-rate bf16 MXU
    else:
        op_dtype = jnp.float32         # q values too large for bf16 exactness

    # ---- quantize activation & weight ONCE in the wrapper (reference op order) ----
    q_x = jnp.round(jnp.clip(x.astype(jnp.float32) / in_scale, -1.0, 1.0) * in_thres)
    q_x = q_x.astype(op_dtype)
    q_w = jnp.round(jnp.clip(weight.astype(jnp.float32) / w_scale, -1.0, 1.0) * w_thres)
    q_w = q_w.reshape(Cout, Kdim)

    # ---- im2col on the already-quantized, compact-dtype activations ----
    patches, OH, OW = _im2col(q_x, K, stride, transposed=small_cout)
    M = N * OH * OW
    Kpad = _round_up(Kdim, 128)

    # ---- tile selection: >=4 grid steps (megacore sharding) within a VMEM budget ----
    op_bytes = jnp.dtype(op_dtype).itemsize
    cout_p = _round_up(Cout, 16) if small_cout else _round_up(Cout, 128)
    tm = max(128, min(1024, _round_up(_cdiv(M, 4), 128)))

    def _footprint(t):
        return (2 * t * Kpad * op_bytes          # double-buffered activation tile
                + 2 * t * cout_p * 4             # double-buffered f32 output tile
                + cout_p * Kpad * op_bytes       # resident quantized weights
                + cout_p * 4 + 4096)             # bias + slack

    while tm > 128 and _footprint(tm) > 24 * 1024 * 1024:   # safe for v7x VMEM too
        tm -= 128
    grid_m = _cdiv(M, tm)
    m_pad = grid_m * tm
    vmem_limit = int(min(48 * 1024 * 1024,
                         max(_footprint(tm) + (2 << 20), 8 << 20)))

    scalars = jnp.stack([
        (in_scale * w_scale) / jnp.float32(in_thres * w_thres),   # post-matmul de-scale
        1.0 / out_scale,                                          # 1/out_scale
        jnp.float32(out_thres),
        out_scale / jnp.float32(out_thres),                       # output de-quant
    ]).astype(jnp.float32)

    compiler_params = pltpu.CompilerParams(
        dimension_semantics=("parallel",),
        vmem_limit_bytes=vmem_limit,
    )

    if small_cout:
        # ---- transposed layout: Cout on sublanes, M lane-dense ----
        patches_t = jnp.pad(patches, ((0, Kpad - Kdim), (0, m_pad - M)))
        qw_t = jnp.pad(q_w, ((0, cout_p - Cout), (0, Kpad - Kdim))).astype(op_dtype)
        b_col = jnp.pad(bias.astype(jnp.float32).reshape(Cout, 1),
                        ((0, cout_p - Cout), (0, 0)))
        out_mat = pl.pallas_call(
            _qconv_kernel_t,
            out_shape=jax.ShapeDtypeStruct((cout_p, m_pad), jnp.float32),
            grid=(grid_m,),
            in_specs=[
                pl.BlockSpec((Kpad, tm), lambda i: (0, i)),        # activation tile
                pl.BlockSpec((cout_p, Kpad), lambda i: (0, 0)),    # weights (resident)
                pl.BlockSpec((cout_p, 1), lambda i: (0, 0)),       # bias    (resident)
                pl.BlockSpec(memory_space=pltpu.MemorySpace.SMEM), # scalars
            ],
            out_specs=pl.BlockSpec((cout_p, tm), lambda i: (0, i)),
            compiler_params=compiler_params,
        )(patches_t, qw_t, b_col, scalars)
        out = out_mat[:Cout, :M].reshape(Cout, N, OH, OW).transpose(1, 0, 2, 3)
    else:
        # ---- standard layout: Cout lane-dense (Cout >= 128) ----
        patches_p = jnp.pad(patches, ((0, m_pad - M), (0, Kpad - Kdim)))
        qw_m = jnp.pad(q_w.T, ((0, Kpad - Kdim), (0, cout_p - Cout))).astype(op_dtype)
        b_row = jnp.pad(bias.astype(jnp.float32).reshape(1, Cout),
                        ((0, 0), (0, cout_p - Cout)))
        out_mat = pl.pallas_call(
            _qconv_kernel_std,
            out_shape=jax.ShapeDtypeStruct((m_pad, cout_p), jnp.float32),
            grid=(grid_m,),
            in_specs=[
                pl.BlockSpec((tm, Kpad), lambda i: (i, 0)),
                pl.BlockSpec((Kpad, cout_p), lambda i: (0, 0)),
                pl.BlockSpec((1, cout_p), lambda i: (0, 0)),
                pl.BlockSpec(memory_space=pltpu.MemorySpace.SMEM),
            ],
            out_specs=pl.BlockSpec((tm, cout_p), lambda i: (i, 0)),
            compiler_params=compiler_params,
        )(patches_p, qw_m, b_row, scalars)
        out = out_mat[:M, :Cout].reshape(N, OH, OW, Cout).transpose(0, 3, 1, 2)

    return out


if __name__ == "__main__":
    key = jax.random.PRNGKey(0)
    k_x, k_w, k_b = jax.random.split(key, 3)

    N, Cin, H, W = 2, 4, 16, 16
    Cout, K = 8, 3

    # mode='activation_in' asserts the scaled input is non-negative -> uniform [0, 1)
    x = jax.random.uniform(k_x, (N, Cin, H, W), dtype=jnp.float32)
    fan_in = Cin * K * K
    bound = 1.0 / (fan_in ** 0.5)
    weight = jax.random.uniform(k_w, (Cout, Cin, K, K), minval=-bound, maxval=bound,
                                dtype=jnp.float32)
    bias = jax.random.uniform(k_b, (Cout,), minval=-bound, maxval=bound,
                              dtype=jnp.float32)

    out = quantize_conv2d(x, weight, bias)
    jax.block_until_ready(out)
    assert out.shape == (N, Cout, H - K + 1, W - K + 1)

    # Pure-JAX reference of the same quantized forward.
    def _q(v, scale, qbit):
        thres = 2.0 ** (qbit - 1) - 1.0
        return jnp.round(jnp.clip(v / scale, -1.0, 1.0) * thres) * (scale / thres)

    q_in = _q(x, 1.0, 8)
    q_wt = _q(weight, jnp.max(jnp.abs(weight)), 8)
    ref = jax.lax.conv_general_dilated(
        q_in, q_wt, (1, 1), "VALID",
        dimension_numbers=("NCHW", "OIHW", "NCHW"))
    ref = _q(ref + bias[None, :, None, None], 1.0, 8)

    err = jnp.abs(out - ref)
    quant_step = 1.0 / (2.0 ** 7 - 1.0)
    # Elementwise agreement up to fp-accumulation-order noise; tolerate an
    # (extremely rare) single-level tie flip from the fused 1/out_scale multiplier.
    assert float(jnp.max(err)) < quant_step + 1e-4
    assert float(jnp.mean((err < 1e-4).astype(jnp.float32))) > 0.999

    print("KERNEL_OK")
</pallas_src>

<mosaic_0001>
module attributes {stable_mosaic.version = 11 : i64} {
  func.func @_qconv_kernel_t(%arg0: i32, %arg1: memref<128x128xbf16, #tpu.memory_space<vmem>>, %arg2: memref<16x128xbf16, #tpu.memory_space<vmem>>, %arg3: memref<16x1xf32, #tpu.memory_space<vmem>>, %arg4: memref<4xf32, #tpu.memory_space<smem>>, %arg5: memref<16x128xf32, #tpu.memory_space<vmem>>) attributes {dimension_semantics = [#tpu.dimension_semantics<parallel>], iteration_bounds = array<i64: 4>, scalar_prefetch = 0 : i64, scratch_operands = 0 : i64, tpu.core_type = #tpu.core_type<tc>, window_params = [{transform_indices = @transform_0, window_bounds = array<i64: 128, 128>}, {pipeline_mode = #tpu.pipeline_mode<synchronous>, transform_indices = @transform_1, window_bounds = array<i64: 16, 128>}, {pipeline_mode = #tpu.pipeline_mode<synchronous>, transform_indices = @transform_2, window_bounds = array<i64: 16, 1>}, {transform_indices = @transform_3, window_bounds = array<i64: 4>}, {transform_indices = @transform_4, window_bounds = array<i64: 16, 128>}]} {
    %c0 = arith.constant 0 : index
    %c0_0 = arith.constant 0 : index
    %0 = vector.load %arg2[%c0, %c0_0] : memref<16x128xbf16, #tpu.memory_space<vmem>>, vector<16x128xbf16>
    %c0_1 = arith.constant 0 : index
    %c0_2 = arith.constant 0 : index
    %1 = vector.load %arg1[%c0_1, %c0_2] : memref<128x128xbf16, #tpu.memory_space<vmem>>, vector<128x128xbf16>
    %cst = arith.constant dense<0.000000e+00> : vector<16x128xf32>
    %2 = tpu.matmul %0, %1, %cst {dimension_numbers = #tpu.dot_dimension_numbers<[1], [0], [0], [1], [0, 0, 1, 1], [], []>} : vector<16x128xbf16>, vector<128x128xbf16>, vector<16x128xf32> -> vector<16x128xf32>
    %c0_3 = arith.constant 0 : index
    %3 = memref.load %arg4[%c0_3] : memref<4xf32, #tpu.memory_space<smem>>
    %4 = vector.broadcast %3 : f32 to vector<16x128xf32>
    %5 = arith.mulf %2, %4 : vector<16x128xf32>
    %c0_4 = arith.constant 0 : index
    %c0_5 = arith.constant 0 : index
    %6 = vector.load %arg3[%c0_4, %c0_5] : memref<16x1xf32, #tpu.memory_space<vmem>>, vector<16x1xf32>
    %7 = vector.broadcast %6 : vector<16x1xf32> to vector<16x128xf32>
    %8 = arith.addf %5, %7 : vector<16x128xf32>
    %c1 = arith.constant 1 : index
    %9 = memref.load %arg4[%c1] : memref<4xf32, #tpu.memory_space<smem>>
    %10 = vector.broadcast %9 : f32 to vector<16x128xf32>
    %11 = arith.mulf %8, %10 : vector<16x128xf32>
    %cst_6 = arith.constant -1.000000e+00 : f32
    %cst_7 = arith.constant 1.000000e+00 : f32
    %12 = vector.broadcast %cst_6 : f32 to vector<16x128xf32>
    %13 = arith.maximumf %12, %11 : vector<16x128xf32>
    %14 = vector.broadcast %cst_7 : f32 to vector<16x128xf32>
    %15 = arith.minimumf %14, %13 : vector<16x128xf32>
    %c2 = arith.constant 2 : index
    %16 = memref.load %arg4[%c2] : memref<4xf32, #tpu.memory_space<smem>>
    %17 = vector.broadcast %16 : f32 to vector<16x128xf32>
    %18 = arith.mulf %15, %17 : vector<16x128xf32>
    %19 = math.roundeven %18 : vector<16x128xf32>
    %c3 = arith.constant 3 : index
    %20 = memref.load %arg4[%c3] : memref<4xf32, #tpu.memory_space<smem>>
    %21 = vector.broadcast %20 : f32 to vector<16x128xf32>
    %22 = arith.mulf %19, %21 : vector<16x128xf32>
    %c0_8 = arith.constant 0 : index
    %c0_9 = arith.constant 0 : index
    %23 = vector.load %arg5[%c0_8, %c0_9] : memref<16x128xf32, #tpu.memory_space<vmem>>, vector<16x128xf32>
    tpu.vector_store %arg5[%c0_8, %c0_9], %22 {strides = array<i32>} : memref<16x128xf32, #tpu.memory_space<vmem>>, vector<16x128xf32>,
    return
  }
  func.func @transform_0(%arg0: i32) -> (i32, i32) {
    %c0_i32 = arith.constant 0 : i32
    %c0_i32_0 = arith.constant 0 : i32
    return %c0_i32, %arg0 : i32, i32
  }
  func.func @transform_1(%arg0: i32) -> (i32, i32) {
    %c0_i32 = arith.constant 0 : i32
    %c0_i32_0 = arith.constant 0 : i32
    %c0_i32_1 = arith.constant 0 : i32
    return %c0_i32, %c0_i32_0 : i32, i32
  }
  func.func @transform_2(%arg0: i32) -> (i32, i32) {
    %c0_i32 = arith.constant 0 : i32
    %c0_i32_0 = arith.constant 0 : i32
    %c0_i32_1 = arith.constant 0 : i32
    return %c0_i32, %c0_i32_0 : i32, i32
  }
  func.func @transform_3(%arg0: i32) -> i32 {
    %c0_i32 = arith.constant 0 : i32
    %c0_i32_0 = arith.constant 0 : i32
    return %c0_i32 : i32
  }
  func.func @transform_4(%arg0: i32) -> (i32, i32) {
    %c0_i32 = arith.constant 0 : i32
    %c0_i32_0 = arith.constant 0 : i32
    return %c0_i32, %arg0 : i32, i32
  }
}

</mosaic_0001>

<bundles_post_ra>
// kernel: quantize_conv2d.1
= control target key start
LH: loop header
LB: loop body
LE: loop exit
PB: predicated region body
PF: predicated region fallthrough
CT: control target
= control target key end

     0   :  { %9 = vsyncpa [#allocation4], 0  ;;  %s769_s15 = smov 0   ;;  %s771_s16 = smov 0   ;;  %s894_s0 = inlined_call_operand.vmem [shape: bf16[128,512], index: 0, kind: input, shape index: {}]   ;;  %s895_s1 = inlined_call_operand.vmem [shape: bf16[16,128], index: 1, kind: input, shape index: {}]   ;;  %s896_s2 = inlined_call_operand.vmem [shape: f32[16,1], index: 2, kind: input, shape index: {}]   ;;  %s897_s3 = inlined_call_operand.vmem [shape: f32[4], index: 3, kind: input, shape index: {}]   ;;  %s898_s4 = inlined_call_operand.vmem [shape: f32[16,512], index: 4, kind: output, shape index: {}]  }
   0x1   :  { %s773_s17 = smov 0  }
   0x2 LB: > { %s785_s18 = sadd.s32 4294967295, %s738_s17   ;;  %s788_s19 = sadd.s32 1, %s738_s17   ;;  %s738_s17 = sphi %s773_s17, %s905_s17   ;;  %s734_s16 = sphi %s771_s16, %s904_s16   ;;  %s730_s15 = sphi %s769_s15, %s903_s15  }
   0x3   : > { %s19_s20 = ssub.s32 %s738_s17, %s788_s19  ;;  %s22_s21 = sadd.s32 1, %s734_s16 }
   0x4   : > { %p20_p0 = scmp.eq.s32.totalorder %s19_s20, 0  ;;  %p29_p1 = scmp.ne.s32.totalorder %s734_s16, %s730_s15 }
   0x5   : > { %p30_p2 = scmp.eq.s32.totalorder %s738_s17, 0  ;;  %p122_p3 = scmp.eq.s32.totalorder %s785_s18, 3 }
   0x6   : > { %s798_s22 = scalar_select %p20_p0, %s734_s16, %s22_s21  }
   0x7   : > { %p800_p4 = por %p30_p2, %p29_p1  ;;  %p804_p5 = por %p122_p3, %p29_p1 }
   0x8   : > { %p577_p6 = scmp.ge.s32.totalorder %s738_s17, 1  ;;  %p135_p7 = scmp.lt.s32.totalorder %s738_s17, 5 }
   0x9   : > { %s900_s24 = scalar_select %p804_p5, 1, 0 }
   0xa   : > { %p657_p8 = scmp.eq.s32.totalorder %s785_s18, 0  ;;  %p811_p9 = pnand %p577_p6, %p135_p7 }
   0xb   : > { %s154_s28 = sshll.u32 %s897_s3, 4  ;;  %s155_s28 = int_to_ptr.vmem [resolvable:$true] %s154_s28 }
   0xc   : > { %p653_p10 = pneg %p811_p9  ;;  %s697_s29 = scalar_lea.vmem %s155_s28, 16 }
   0xd   : > { %p698_p12 = scmp.ne.s32.totalorder %s155_s28, %s697_s29  ;;  %p705_p2 = scmp.lt.s32.totalorder %s155_s28, %s155_s28 }
   0xe   : > { %p654_p11 = pnand %p657_p8, %p653_p10  ;;  %p706_p3 = scmp.lt.s32.totalorder %s697_s29, %s697_s29 }
  0x10   : > { %p699_p13 = pneg %p654_p11  ;;  %p707_p6 = por %p706_p3, %p705_p2 }
  0x12   : > { %p700_p0 = pnand %p699_p13, %p698_p12 }
  0x14   : > { %p701_p1 = pneg %p700_p0 }
  0x16   : > { %p708_p7 = pnand %p707_p6, %p701_p1 }
  0x18   : > { %711 = shalt.err (!%p708_p7)
}
  0x19   : > { %s740_s30 = smov [#allocation3]   ;;  %p579_p5 = scmp.ge.s32.totalorder %s738_s17, 4 }
  0x1a   : > { %656 = dma.vmem_to_smem (!%p654_p11), %s155_s28, 16, %s740_s30, [#allocation4]  }
  0x1b   : > { %161 = sbr.rel (%p579_p5) target bundleno = 47 (0x2f), region = 28 }
  0x20   : > { %164 = sbr.rel (!%p800_p4) target bundleno = 47 (0x2f), region = 32  ;;  %s166_s5 = sand.u32 (%p800_p4), 1, %s734_s16  }
  0x21   : > { %s581_s6 = sshll.u32 (%p800_p4), %s738_s17, 2  ;;  %s580_s7 = sshll.u32 (%p800_p4), %s166_s5, 6 }
  0x22   : > { %s830_s10 = scalar_lea.vmem (%p800_p4), %s894_s0, %s581_s6  ;;  %s168_s11 = scalar_lea.vmem (%p800_p4), [#allocation2], %s580_s7 }
  0x23   : > { %v187_v0 = vld [vmem:[%s830_s10] sm:$0xf] (%p800_p4)  ;;  %v189_v1 = vld [vmem:[%s830_s10 + $0x10] sm:$0xf] (%p800_p4) }
  0x24   : > { %188 = vst [vmem:[%s168_s11] sm:$0xf] (%p800_p4), %v187_v0  ;;  %190 = vst [vmem:[%s168_s11 + $0x4] sm:$0xf] (%p800_p4), %v189_v1  ;;  %v191_v2 = vld [vmem:[%s830_s10 + $0x20] sm:$0xf] (%p800_p4) }
  0x25   : > { %v193_v3 = vld [vmem:[%s830_s10 + $0x30] sm:$0xf]  ;;  %v195_v4 = vld [vmem:[%s830_s10 + $0x40] sm:$0xf]  ;;  %192 = vst [vmem:[%s168_s11 + $0x8] sm:$0xf] %v191_v2 }
  0x26   : > { %194 = vst [vmem:[%s168_s11 + $0xc] sm:$0xf] %v193_v3  ;;  %196 = vst [vmem:[%s168_s11 + $0x10] sm:$0xf] %v195_v4  ;;  %v197_v5 = vld [vmem:[%s830_s10 + $0x50] sm:$0xf] }
  0x27   : > { %v199_v6 = vld [vmem:[%s830_s10 + $0x60] sm:$0xf]  ;;  %v201_v7 = vld [vmem:[%s830_s10 + $0x70] sm:$0xf]  ;;  %198 = vst [vmem:[%s168_s11 + $0x14] sm:$0xf] %v197_v5 }
  0x28   : > { %200 = vst [vmem:[%s168_s11 + $0x18] sm:$0xf] %v199_v6  ;;  %202 = vst [vmem:[%s168_s11 + $0x1c] sm:$0xf] %v201_v7  ;;  %v203_v8 = vld [vmem:[%s830_s10 + $0x80] sm:$0xf] }
  0x29   : > { %v205_v9 = vld [vmem:[%s830_s10 + $0x90] sm:$0xf]  ;;  %v207_v10 = vld [vmem:[%s830_s10 + $0xa0] sm:$0xf]  ;;  %204 = vst [vmem:[%s168_s11 + $0x20] sm:$0xf] %v203_v8 }
  0x2a   : > { %206 = vst [vmem:[%s168_s11 + $0x24] sm:$0xf] %v205_v9  ;;  %208 = vst [vmem:[%s168_s11 + $0x28] sm:$0xf] %v207_v10  ;;  %v209_v11 = vld [vmem:[%s830_s10 + $0xb0] sm:$0xf] }
  0x2b   : > { %v211_v12 = vld [vmem:[%s830_s10 + $0xc0] sm:$0xf]  ;;  %v213_v13 = vld [vmem:[%s830_s10 + $0xd0] sm:$0xf]  ;;  %210 = vst [vmem:[%s168_s11 + $0x2c] sm:$0xf] %v209_v11 }
  0x2c   : > { %212 = vst [vmem:[%s168_s11 + $0x30] sm:$0xf] %v211_v12  ;;  %214 = vst [vmem:[%s168_s11 + $0x34] sm:$0xf] %v213_v13  ;;  %v215_v14 = vld [vmem:[%s830_s10 + $0xe0] sm:$0xf] }
  0x2d   : > { %v217_v15 = vld [vmem:[%s830_s10 + $0xf0] sm:$0xf]  ;;  %216 = vst [vmem:[%s168_s11 + $0x38] sm:$0xf] %v215_v14 }
  0x2e   : > { %218 = vst [vmem:[%s168_s11 + $0x3c] sm:$0xf] %v217_v15 }
  0x2f PF: > { %277 = sbr.rel (%p811_p9) target bundleno = 315 (0x13b), region = 73  ;;  %s280_s12 = sand.u32 (!%p811_p9), 1, %s730_s15  }
  0x30   : > { %s583_s13 = sshll.u32 (!%p811_p9), %s280_s12, 6 }
  0x31   : > { %s853_s14 = scalar_lea.vmem (!%p811_p9), [#allocation2], %s583_s13 }
  0x34   : > { %725 = dma.done.wait (%p657_p8), [#allocation4], 16  }
  0x35   : > { %727 = vsyncadd (%p657_p8), [#allocation4], 4294967280 }
  0x36   : > { %290 = sfence }
  0x37   : > { %v688_v16 = vld [vmem:[%s853_s14 + $0x38] sm:$0xff]   ;;  %v741_v17 = vmov 0.0   ;;  %v689_v18 = vld [vmem:[%s853_s14 + $0x30] sm:$0xff]   ;;  %vm742_vm0 = vmmov 0   ;;  %v743_v19 = vmov 0   ;;  %v690_v20 = vld [vmem:[%s853_s14 + $0x28] sm:$0xff]  }
  0x38   : > { %613 = vmatprep.subr.bf16.mxu0 %v741_v17  ;;  %629 = vmatprep.mubr.msk.bf16.mxu0 %vm742_vm0, %v741_v17  ;;  %v427_v21 = vld [vmem:[%s896_s2] sm:$0xff]  ;;  %v428_v23 = vld [vmem:[%s896_s2 + $0x8] sm:$0xff]  ;;  %v692_v24 = vld [vmem:[%s853_s14 + $0x18] sm:$0xff]   ;;  %s423_s27 = sld [smem:[#allocation3]]  ;;  %s585_s5 = sshll.u32 %s280_s12, 4 }
  0x39   : > { %614 = vmatpush3.bf16.msra.mxu0 %v688_v16  ;;  %687 = vset.pattern.permute.xlu0 %v743_v19  ;;  %v691_v22 = vld [vmem:[%s853_s14 + $0x20] sm:$0xff]   ;;  %v693_v25 = vld [vmem:[%s853_s14 + $0x10] sm:$0xff]   ;;  %v694_v26 = vld [vmem:[%s853_s14 + $0x8] sm:$0xff]   ;;  %s595_s28 = sld [smem:[#allocation3 + $0x1]]  ;;  %s308_s6 = scalar_lea.vmem [#allocation5], %s585_s5 }
  0x3a   : > { %615 = vmatprep.subr.bf16.mxu0 %v741_v17  ;;  %431 = vperm.xlu0 %687, %v427_v21   ;;  %v695_v27 = vld [vmem:[%s853_s14] sm:$0xff]   ;;  %s598_s29 = sld [smem:[#allocation3 + $0x2]]  ;;  %p902_p4 = scmp.ne.s32.totalorder %s900_s24, 0 }
  0x3b   : > { %v696_v28 = vld [vmem:[%s895_s1] sm:$0xff]   ;;  %s599_s30 = sld [smem:[#allocation3 + $0x3]]  ;;  %s601_s15 = sshll.u32 (%p902_p4), %s785_s18, 3 }
  0x3c   : > { %s469_s9 = scalar_lea.vmem (%p902_p4), %s898_s4, %s601_s15 }
  0x3d   : > { %616 = vmatpush3.bf16.msra.mxu0 %v689_v18 }
  0x3e   : > { %617 = vmatprep.subr.bf16.mxu0 %v741_v17  ;;  %436 = vperm.xlu0 %687, %v428_v23   ;;  %v424_v29 = vstv %s423_s27 }
  0x3f   : > { %v442_v33 = vstv %s595_s28 }
  0x40   : > { %v450_v39 = vstv %s598_s29 }
  0x41   : > { %618 = vmatpush3.bf16.msra.mxu0 %v690_v20  ;;  %v456_v55 = vstv %s599_s30 }
  0x42   : > { %619 = vmatprep.subr.bf16.mxu0 %v741_v17 }
  0x45   : > { %620 = vmatpush3.bf16.msra.mxu0 %v691_v22 }
  0x46   : > { %621 = vmatprep.subr.bf16.mxu0 %v741_v17 }
  0x49   : > { %622 = vmatpush3.bf16.msra.mxu0 %v692_v24 }
  0x4a   : > { %623 = vmatprep.subr.bf16.mxu0 %v741_v17 }
  0x4d   : > { %624 = vmatpush3.bf16.msra.mxu0 %v693_v25 }
  0x4e   : > { %625 = vmatprep.subr.bf16.mxu0 %v741_v17 }
  0x51   : > { %626 = vmatpush3.bf16.msra.mxu0 %v694_v26 }
  0x52   : > { %627 = vmatprep.subr.bf16.mxu0 %v741_v17 }
  0x55   : > { %628 = vmatpush3.bf16.msra.mxu0 %v695_v27 }
  0x58   : > { %630 = vmatmul.mubr.bf16.vlgmr.msra.gmra.mxu0 %v696_v28 }
  0xb5   : > { %v432_v30 = vpop.permute.xlu0 %431 }
  0xb9   : > { %v437_v40 = vpop.permute.xlu0 %436 }
 0x118   : > { %v416_v31 = vpop.f32.mrf.mxu0 }
 0x119   : > { %v425_v32 = vmul.f32 %v424_v29, %v416_v31 }
 0x11a   : > { %v631_v34 = vpop.f32.mrf.mxu0 }
 0x11b   : > { %v439_v35 = vadd.f32 %v432_v30, %v425_v32 }
 0x11c   : > { %v419_v36 = vpop.f32.mrf.mxu0 }
 0x11d   : > { %v443_v37 = vmul.f32 %v442_v33, %v439_v35  ;;  %v426_v38 = vmul.f32 %v424_v29, %v419_v36 }
 0x11e   : > { %v632_v41 = vpop.f32.mrf.mxu0 }
 0x11f   : > { %v596_v42 = vclamps-f32 %v443_v37, 1.0  ;;  %v440_v43 = vadd.f32 %v437_v40, %v426_v38 }
 0x121   : > { %v451_v44 = vmul.f32 %v596_v42, %v450_v39  ;;  %v444_v45 = vmul.f32 %v442_v33, %v440_v43 }
 0x123   : > { %v635_v46 = vcvt.f32.s32 %v451_v44  ;;  %v597_v47 = vclamps-f32 %v444_v45, 1.0  ;;  %v633_v50 = vand.u32 2147483647, %v451_v44  ;;  %v638_v52 = vand.u32 2147483648, %v451_v44 }
 0x125   : > { %v636_v48 = vcvt.s32.f32 %v635_v46  ;;  %v452_v49 = vmul.f32 %v597_v47, %v450_v39  ;;  %vm634_vm1 = vcmp.lt.f32.partialorder %v633_v50, 8388608.0 }
 0x127   : > { %v637_v51 = vand.u32 2147483647, %v636_v48  ;;  %v643_v53 = vcvt.f32.s32 %v452_v49  ;;  %v641_v57 = vand.u32 2147483647, %v452_v49  ;;  %v646_v60 = vand.u32 2147483648, %v452_v49 }
 0x129   : > { %v639_v54 = vor.u32 %v638_v52, %v637_v51  ;;  %v644_v56 = vcvt.s32.f32 %v643_v53  ;;  %vm642_vm2 = vcmp.lt.f32.partialorder %v641_v57, 8388608.0 }
 0x12b   : > { %v640_v58 = vsel %vm634_vm1, %v639_v54, %v451_v44  ;;  %v645_v59 = vand.u32 2147483647, %v644_v56 }
 0x12c   : > { %v457_v61 = vmul.f32 %v640_v58, %v456_v55 }
 0x12d   : > { %v647_v62 = vor.u32 %v646_v60, %v645_v59 }
 0x12e   : > { %459 = vst [vmem:[%s308_s6] sm:$0xff] %v457_v61  ;;  %467 = sbr.rel (!%p902_p4) target bundleno = 315 (0x13b), region = 85 }
 0x12f   : > { %v648_v63 = vsel %vm642_vm2, %v647_v62, %v452_v49 }
 0x130   : > { %v458_v0 = vmul.f32 %v648_v63, %v456_v55 }
 0x132   : > { %460 = vst [vmem:[%s308_s6 + $0x8] sm:$0xff] %v458_v0 }
 0x135   : > { %v500_v1 = vld [vmem:[%s308_s6] sm:$0xff] }
 0x136   : > { %501 = vst [vmem:[%s469_s9] sm:$0xff] %v500_v1 }
 0x139   : > { %v502_v2 = vld [vmem:[%s308_s6 + $0x8] sm:$0xff] }
 0x13a   : > { %503 = vst [vmem:[%s469_s9 + $0x20] sm:$0xff] %v502_v2 }
 0x13b PF: > { %p12_p5 = scmp.ge.s32.totalorder %s788_s19, 6   ;;  %s903_s15 = smov %s734_s16 }
 0x13c   : > { %s904_s16 = smov %s798_s22  ;;  %s905_s17 = smov %s788_s19 }
 0x13d   :  { %14 = sbr.rel (!%p12_p5) target bundleno = 2 (0x2), region = 155 }
 0x142   :  { %519 = vsyncpa [#allocation4], 1 }
 0x143   :  { %521 = vsyncpa [#allocation4 + $0x1], 1 }

</bundles_post_ra>
